<compile_context>
chip_gen: v6e
topology: v6e:2x2x1
jax: 0.10.0
libtpu: 0.0.40
codegen_flags: <defaults>
</compile_context>

<pallas_src>
import jax
import jax.numpy as jnp
from jax.experimental import pallas as pl
from jax.experimental.pallas import tpu as pltpu

BN_EPS = 1e-5
LANE = 128


def _round_up(n, m=LANE):
    return ((n + m - 1) // m) * m


def _pick_tile(n):
    for t in (512, 256, 128):
        if n % t == 0:
            return t
    return n


def _pad2d(a, rows, cols):
    pr, pc = rows - a.shape[0], cols - a.shape[1]
    if pr == 0 and pc == 0:
        return a
    return jnp.pad(a, ((0, pr), (0, pc)))


def _bn_relu_f32(h, gamma, beta):
    # Training-mode BatchNorm1d over the full batch (biased variance), then ReLU. All f32.
    mean = jnp.mean(h, axis=0, keepdims=True)
    centered = h - mean
    var = jnp.mean(centered * centered, axis=0, keepdims=True)
    h_bn = centered * jax.lax.rsqrt(var + BN_EPS) * gamma + beta
    return jnp.maximum(h_bn, 0.0)


def autoencoder_kernel(
    x_ref,                              # (B, TILE_F) bf16 — phase-0 K tile of the input
    w1_ref, b1_ref, g1_ref, bt1_ref,    # Linear(in,128) + BN(128)
    w2_ref, b2_ref,                     # Linear(128, hidden)
    w3_ref, b3_ref, g2_ref, bt2_ref,    # Linear(hidden,128) + BN(128)
    w4_ref, b4_ref,                     # Linear(128, in) — phase-1 N tile
    recon_ref, latent_ref,
    h1_acc, h2_buf,
):
    phase = pl.program_id(0)
    t = pl.program_id(1)
    num_t = pl.num_programs(1)

    # ---------------- phase 0: encoder (K-tiled over input_size) ----------------
    @pl.when((phase == 0) & (t == 0))
    def _init():
        h1_acc[...] = jnp.zeros_like(h1_acc)

    @pl.when(phase == 0)
    def _accumulate():
        # bf16 x bf16 -> f32 accumulate on the MXU.
        h1_acc[...] += jnp.dot(x_ref[...], w1_ref[...],
                               preferred_element_type=jnp.float32)

    @pl.when((phase == 0) & (t == num_t - 1))
    def _finish_encoder():
        h1 = _bn_relu_f32(h1_acc[...] + b1_ref[...], g1_ref[...], bt1_ref[...])
        latent = jnp.dot(h1.astype(jnp.bfloat16), w2_ref[...],
                         preferred_element_type=jnp.float32) + b2_ref[...]
        latent_ref[...] = latent.astype(latent_ref.dtype)
        h2 = jnp.dot(latent.astype(jnp.bfloat16), w3_ref[...],
                     preferred_element_type=jnp.float32) + b3_ref[...]
        h2_buf[...] = _bn_relu_f32(h2, g2_ref[...], bt2_ref[...]).astype(h2_buf.dtype)

    # ---------------- phase 1: decoder output tiles (N-tiled over input_size) ----------------
    @pl.when(phase == 1)
    def _decode_tile():
        out = jnp.dot(h2_buf[...], w4_ref[...],
                      preferred_element_type=jnp.float32) + b4_ref[...]
        # sigmoid(x) == 0.5 * (tanh(x/2) + 1): tanh goes to the EUP, no f32 divide on the VALU.
        recon_ref[...] = (0.5 * (jnp.tanh(0.5 * out) + 1.0)).astype(recon_ref.dtype)


@jax.jit
def autoencoder_forward(x, params):
    B, input_size = x.shape
    hidden_size = params["w2"].shape[1]

    in_p = _round_up(input_size)
    hid_p = _round_up(hidden_size)
    tile_f = _pick_tile(in_p)
    num_t = in_p // tile_f

    # Zero-padding is exact: padded x columns / weight rows contribute 0 to every dot product
    # and padded output columns are sliced off below.
    xp  = _pad2d(x, B, in_p).astype(jnp.bfloat16)
    w1p = _pad2d(params["w1"], in_p, LANE).astype(jnp.bfloat16)
    w2p = _pad2d(params["w2"], LANE, hid_p).astype(jnp.bfloat16)
    w3p = _pad2d(params["w3"], hid_p, LANE).astype(jnp.bfloat16)
    w4p = _pad2d(params["w4"], LANE, in_p).astype(jnp.bfloat16)
    b2p = _pad2d(params["b2"], 1, hid_p)
    b4p = _pad2d(params["b4"], 1, in_p)
    b1, g1, bt1 = params["b1"], params["g1"], params["bt1"]
    b3, g2, bt2 = params["b3"], params["g2"], params["bt2"]

    # index maps receive (phase p, tile t):
    #   phase 0 streams K tiles of x / w1; phase 1 pins them to the last tile (no extra DMA).
    #   phase 0 pins w4 / b4 / recon to tile 0; phase 1 streams N tiles (t * p).
    x_idx   = lambda p, t: (0, t * (1 - p) + (num_t - 1) * p)
    w1_idx  = lambda p, t: (t * (1 - p) + (num_t - 1) * p, 0)
    dec_idx = lambda p, t: (0, t * p)
    const   = lambda p, t: (0, 0)

    in_specs = [
        pl.BlockSpec((B, tile_f), x_idx),        # x
        pl.BlockSpec((tile_f, LANE), w1_idx),    # w1
        pl.BlockSpec((1, LANE), const),          # b1
        pl.BlockSpec((1, LANE), const),          # g1
        pl.BlockSpec((1, LANE), const),          # bt1
        pl.BlockSpec((LANE, hid_p), const),      # w2
        pl.BlockSpec((1, hid_p), const),         # b2
        pl.BlockSpec((hid_p, LANE), const),      # w3
        pl.BlockSpec((1, LANE), const),          # b3
        pl.BlockSpec((1, LANE), const),          # g2
        pl.BlockSpec((1, LANE), const),          # bt2
        pl.BlockSpec((LANE, tile_f), dec_idx),   # w4
        pl.BlockSpec((1, tile_f), dec_idx),      # b4
    ]
    out_specs = (
        pl.BlockSpec((B, tile_f), dec_idx),      # recon (lane-dense tiles)
        pl.BlockSpec((B, hid_p), const),         # latent (lane-dense, padded)
    )

    flops = 4 * B * LANE * (in_p + hid_p)                    # four matmuls
    bytes_accessed = (
        2 * B * in_p                                         # x (bf16)
        + 4 * LANE * (in_p + hid_p)                          # weights (bf16)
        + 4 * (6 * LANE + hid_p + in_p)                      # biases + BN params (f32)
        + 4 * B * (in_p + hid_p)                             # outputs (f32)
    )

    recon_p, latent_p = pl.pallas_call(
        autoencoder_kernel,
        out_shape=(
            jax.ShapeDtypeStruct((B, in_p), jnp.float32),
            jax.ShapeDtypeStruct((B, hid_p), jnp.float32),
        ),
        grid=(2, num_t),
        in_specs=in_specs,
        out_specs=out_specs,
        scratch_shapes=[
            pltpu.VMEM((B, LANE), jnp.float32),    # h1 accumulator (full-batch, f32)
            pltpu.VMEM((B, LANE), jnp.bfloat16),   # post-BN/ReLU decoder hidden (matmul LHS)
        ],
        compiler_params=pltpu.CompilerParams(
            # phase axis carries h2 scratch, tile axis carries the h1 K-accumulator -> sequential.
            dimension_semantics=("arbitrary", "arbitrary"),
            vmem_limit_bytes=64 * 1024 * 1024,
        ),
        cost_estimate=pl.CostEstimate(
            flops=flops,
            transcendentals=B * in_p + 4 * B * LANE,
            bytes_accessed=bytes_accessed,
        ),
    )(xp, w1p, b1, g1, bt1, w2p, b2p, w3p, b3, g2, bt2, w4p, b4p)

    return recon_p[:, :input_size], latent_p[:, :hidden_size]


def init_params(key, input_size, hidden_size):
    """Deterministic synthetic parameters (shapes match the PyTorch module)."""
    ks = jax.random.split(key, 8)

    def lin(kw, kb, fan_in, fan_out):
        bound = 1.0 / (fan_in ** 0.5)
        w = jax.random.uniform(kw, (fan_in, fan_out), jnp.float32, -bound, bound)
        b = jax.random.uniform(kb, (1, fan_out), jnp.float32, -bound, bound)
        return w, b

    w1, b1 = lin(ks[0], ks[1], input_size, 128)
    w2, b2 = lin(ks[2], ks[3], 128, hidden_size)
    w3, b3 = lin(ks[4], ks[5], hidden_size, 128)
    w4, b4 = lin(ks[6], ks[7], 128, input_size)

    ones128 = jnp.ones((1, 128), jnp.float32)
    zeros128 = jnp.zeros((1, 128), jnp.float32)
    return dict(
        w1=w1, b1=b1, g1=ones128, bt1=zeros128,
        w2=w2, b2=b2,
        w3=w3, b3=b3, g2=ones128, bt2=zeros128,
        w4=w4, b4=b4,
    )


def reference_forward(x, params):
    """Pure-JAX reference with the same bf16-operand / f32-accumulate matmul precision."""
    def bdot(a, w):
        return jnp.dot(a.astype(jnp.bfloat16), w.astype(jnp.bfloat16),
                       preferred_element_type=jnp.float32)

    h1 = _bn_relu_f32(bdot(x, params["w1"]) + params["b1"], params["g1"], params["bt1"])
    latent = bdot(h1, params["w2"]) + params["b2"]
    h2 = _bn_relu_f32(bdot(latent, params["w3"]) + params["b3"], params["g2"], params["bt2"])
    recon = jax.nn.sigmoid(bdot(h2, params["w4"]) + params["b4"])
    return recon, latent


if __name__ == "__main__":
    B, INPUT_SIZE, HIDDEN_SIZE = 8, 32, 16

    key = jax.random.PRNGKey(0)
    k_x, k_p = jax.random.split(key)
    x = jax.random.normal(k_x, (B, INPUT_SIZE), jnp.float32)
    params = init_params(k_p, INPUT_SIZE, HIDDEN_SIZE)

    recon, latent = autoencoder_forward(x, params)
    jax.block_until_ready((recon, latent))

    assert recon.shape == (B, INPUT_SIZE)
    assert latent.shape == (B, HIDDEN_SIZE)
    assert bool(jnp.all(jnp.isfinite(recon))) and bool(jnp.all(jnp.isfinite(latent)))
    assert bool(jnp.all((recon >= 0.0) & (recon <= 1.0)))

    recon_ref, latent_ref = reference_forward(x, params)
    assert bool(jnp.allclose(recon, recon_ref, atol=2e-3, rtol=2e-3))
    assert bool(jnp.allclose(latent, latent_ref, atol=2e-3, rtol=2e-3))

    print("KERNEL_OK")
</pallas_src>

<mosaic_0001>
module attributes {stable_mosaic.version = 11 : i64} {
  func.func @autoencoder_kernel(%arg0: i32, %arg1: i32, %arg2: memref<8x128xbf16, #tpu.memory_space<vmem>>, %arg3: memref<128x128xbf16, #tpu.memory_space<vmem>>, %arg4: memref<1x128xf32, #tpu.memory_space<vmem>>, %arg5: memref<1x128xf32, #tpu.memory_space<vmem>>, %arg6: memref<1x128xf32, #tpu.memory_space<vmem>>, %arg7: memref<128x128xbf16, #tpu.memory_space<vmem>>, %arg8: memref<1x128xf32, #tpu.memory_space<vmem>>, %arg9: memref<128x128xbf16, #tpu.memory_space<vmem>>, %arg10: memref<1x128xf32, #tpu.memory_space<vmem>>, %arg11: memref<1x128xf32, #tpu.memory_space<vmem>>, %arg12: memref<1x128xf32, #tpu.memory_space<vmem>>, %arg13: memref<128x128xbf16, #tpu.memory_space<vmem>>, %arg14: memref<1x128xf32, #tpu.memory_space<vmem>>, %arg15: memref<8x128xf32, #tpu.memory_space<vmem>>, %arg16: memref<8x128xf32, #tpu.memory_space<vmem>>, %arg17: memref<8x128xf32, #tpu.memory_space<vmem>>, %arg18: memref<8x128xbf16, #tpu.memory_space<vmem>>) attributes {dimension_semantics = [#tpu.dimension_semantics<arbitrary>, #tpu.dimension_semantics<arbitrary>], iteration_bounds = array<i64: 2, 1>, scalar_prefetch = 0 : i64, scratch_operands = 2 : i64, tpu.core_type = #tpu.core_type<tc>, window_params = [{transform_indices = @transform_0, window_bounds = array<i64: 8, 128>}, {transform_indices = @transform_1, window_bounds = array<i64: 128, 128>}, {pipeline_mode = #tpu.pipeline_mode<synchronous>, transform_indices = @transform_2, window_bounds = array<i64: 1, 128>}, {pipeline_mode = #tpu.pipeline_mode<synchronous>, transform_indices = @transform_3, window_bounds = array<i64: 1, 128>}, {pipeline_mode = #tpu.pipeline_mode<synchronous>, transform_indices = @transform_4, window_bounds = array<i64: 1, 128>}, {pipeline_mode = #tpu.pipeline_mode<synchronous>, transform_indices = @transform_5, window_bounds = array<i64: 128, 128>}, {pipeline_mode = #tpu.pipeline_mode<synchronous>, transform_indices = @transform_6, window_bounds = array<i64: 1, 128>}, {pipeline_mode = #tpu.pipeline_mode<synchronous>, transform_indices = @transform_7, window_bounds = array<i64: 128, 128>}, {pipeline_mode = #tpu.pipeline_mode<synchronous>, transform_indices = @transform_8, window_bounds = array<i64: 1, 128>}, {pipeline_mode = #tpu.pipeline_mode<synchronous>, transform_indices = @transform_9, window_bounds = array<i64: 1, 128>}, {pipeline_mode = #tpu.pipeline_mode<synchronous>, transform_indices = @transform_10, window_bounds = array<i64: 1, 128>}, {transform_indices = @transform_11, window_bounds = array<i64: 128, 128>}, {transform_indices = @transform_12, window_bounds = array<i64: 1, 128>}, {transform_indices = @transform_13, window_bounds = array<i64: 8, 128>}, {pipeline_mode = #tpu.pipeline_mode<synchronous>, transform_indices = @transform_14, window_bounds = array<i64: 8, 128>}]} {
    %c0_i32 = arith.constant 0 : i32
    %0 = arith.cmpi eq, %arg0, %c0_i32 : i32
    %c0_i32_0 = arith.constant 0 : i32
    %1 = arith.cmpi eq, %arg1, %c0_i32_0 : i32
    %2 = arith.andi %0, %1 : i1
    %3 = arith.extui %2 : i1 to i32
    %c0_i32_1 = arith.constant 0 : i32
    %4 = arith.cmpi ne, %3, %c0_i32_1 : i32
    scf.if %4 {
      %cst = arith.constant 0.000000e+00 : f32
      %16 = vector.broadcast %cst : f32 to vector<8x128xf32>
      %c0 = arith.constant 0 : index
      %c0_8 = arith.constant 0 : index
      %17 = vector.load %arg17[%c0, %c0_8] : memref<8x128xf32, #tpu.memory_space<vmem>>, vector<8x128xf32>
      tpu.vector_store %arg17[%c0, %c0_8], %16 {strides = array<i32>} : memref<8x128xf32, #tpu.memory_space<vmem>>, vector<8x128xf32>,
    } else {
    }
    %c0_i32_2 = arith.constant 0 : i32
    %5 = arith.cmpi eq, %arg0, %c0_i32_2 : i32
    %6 = arith.extui %5 : i1 to i32
    %c0_i32_3 = arith.constant 0 : i32
    %7 = arith.cmpi ne, %6, %c0_i32_3 : i32
    scf.if %7 {
      %c0 = arith.constant 0 : index
      %c0_8 = arith.constant 0 : index
      %16 = vector.load %arg17[%c0, %c0_8] : memref<8x128xf32, #tpu.memory_space<vmem>>, vector<8x128xf32>
      %c0_9 = arith.constant 0 : index
      %c0_10 = arith.constant 0 : index
      %17 = vector.load %arg2[%c0_9, %c0_10] : memref<8x128xbf16, #tpu.memory_space<vmem>>, vector<8x128xbf16>
      %c0_11 = arith.constant 0 : index
      %c0_12 = arith.constant 0 : index
      %18 = vector.load %arg3[%c0_11, %c0_12] : memref<128x128xbf16, #tpu.memory_space<vmem>>, vector<128x128xbf16>
      %cst = arith.constant dense<0.000000e+00> : vector<8x128xf32>
      %19 = tpu.matmul %17, %18, %cst {dimension_numbers = #tpu.dot_dimension_numbers<[1], [0], [0], [1], [0, 0, 1, 1], [], []>} : vector<8x128xbf16>, vector<128x128xbf16>, vector<8x128xf32> -> vector<8x128xf32>
      %20 = arith.addf %16, %19 : vector<8x128xf32>
      %c0_13 = arith.constant 0 : index
      %c0_14 = arith.constant 0 : index
      %21 = vector.load %arg17[%c0_13, %c0_14] : memref<8x128xf32, #tpu.memory_space<vmem>>, vector<8x128xf32>
      tpu.vector_store %arg17[%c0_13, %c0_14], %20 {strides = array<i32>} : memref<8x128xf32, #tpu.memory_space<vmem>>, vector<8x128xf32>,
    } else {
    }
    %c0_i32_4 = arith.constant 0 : i32
    %8 = arith.cmpi eq, %arg0, %c0_i32_4 : i32
    %c0_i32_5 = arith.constant 0 : i32
    %9 = arith.cmpi eq, %arg1, %c0_i32_5 : i32
    %10 = arith.andi %8, %9 : i1
    %11 = arith.extui %10 : i1 to i32
    %c0_i32_6 = arith.constant 0 : i32
    %12 = arith.cmpi ne, %11, %c0_i32_6 : i32
    scf.if %12 {
      %c0 = arith.constant 0 : index
      %c0_8 = arith.constant 0 : index
      %16 = vector.load %arg17[%c0, %c0_8] : memref<8x128xf32, #tpu.memory_space<vmem>>, vector<8x128xf32>
      %c0_9 = arith.constant 0 : index
      %c0_10 = arith.constant 0 : index
      %17 = vector.load %arg4[%c0_9, %c0_10] : memref<1x128xf32, #tpu.memory_space<vmem>>, vector<1x128xf32>
      %18 = vector.broadcast %17 : vector<1x128xf32> to vector<8x128xf32>
      %19 = arith.addf %16, %18 : vector<8x128xf32>
      %c0_11 = arith.constant 0 : index
      %c0_12 = arith.constant 0 : index
      %20 = vector.load %arg5[%c0_11, %c0_12] : memref<1x128xf32, #tpu.memory_space<vmem>>, vector<1x128xf32>
      %c0_13 = arith.constant 0 : index
      %c0_14 = arith.constant 0 : index
      %21 = vector.load %arg6[%c0_13, %c0_14] : memref<1x128xf32, #tpu.memory_space<vmem>>, vector<1x128xf32>
      %cst = arith.constant dense<0.000000e+00> : vector<128xf32>
      %22 = vector.multi_reduction <add>, %19, %cst [0] : vector<8x128xf32> to vector<128xf32>
      %23 = vector.shape_cast %22 : vector<128xf32> to vector<1x128xf32>
      %cst_15 = arith.constant 8.000000e+00 : f32
      %24 = vector.broadcast %cst_15 : f32 to vector<1x128xf32>
      %25 = arith.divf %23, %24 : vector<1x128xf32>
      %26 = vector.broadcast %25 : vector<1x128xf32> to vector<8x128xf32>
      %27 = arith.subf %19, %26 : vector<8x128xf32>
      %28 = arith.mulf %27, %27 : vector<8x128xf32>
      %cst_16 = arith.constant dense<0.000000e+00> : vector<128xf32>
      %29 = vector.multi_reduction <add>, %28, %cst_16 [0] : vector<8x128xf32> to vector<128xf32>
      %30 = vector.shape_cast %29 : vector<128xf32> to vector<1x128xf32>
      %cst_17 = arith.constant 8.000000e+00 : f32
      %31 = vector.broadcast %cst_17 : f32 to vector<1x128xf32>
      %32 = arith.divf %30, %31 : vector<1x128xf32>
      %cst_18 = arith.constant 9.99999974E-6 : f32
      %33 = vector.broadcast %cst_18 : f32 to vector<1x128xf32>
      %34 = arith.addf %32, %33 : vector<1x128xf32>
      %35 = math.rsqrt %34 : vector<1x128xf32>
      %36 = vector.broadcast %35 : vector<1x128xf32> to vector<8x128xf32>
      %37 = arith.mulf %27, %36 : vector<8x128xf32>
      %38 = vector.broadcast %20 : vector<1x128xf32> to vector<8x128xf32>
      %39 = arith.mulf %37, %38 : vector<8x128xf32>
      %40 = vector.broadcast %21 : vector<1x128xf32> to vector<8x128xf32>
      %41 = arith.addf %39, %40 : vector<8x128xf32>
      %cst_19 = arith.constant 0.000000e+00 : f32
      %42 = vector.broadcast %cst_19 : f32 to vector<8x128xf32>
      %43 = arith.maximumf %41, %42 : vector<8x128xf32>
      %44 = arith.truncf %43 : vector<8x128xf32> to vector<8x128xbf16>
      %c0_20 = arith.constant 0 : index
      %c0_21 = arith.constant 0 : index
      %45 = vector.load %arg7[%c0_20, %c0_21] : memref<128x128xbf16, #tpu.memory_space<vmem>>, vector<128x128xbf16>
      %cst_22 = arith.constant dense<0.000000e+00> : vector<8x128xf32>
      %46 = tpu.matmul %44, %45, %cst_22 {dimension_numbers = #tpu.dot_dimension_numbers<[1], [0], [0], [1], [0, 0, 1, 1], [], []>} : vector<8x128xbf16>, vector<128x128xbf16>, vector<8x128xf32> -> vector<8x128xf32>
      %c0_23 = arith.constant 0 : index
      %c0_24 = arith.constant 0 : index
      %47 = vector.load %arg8[%c0_23, %c0_24] : memref<1x128xf32, #tpu.memory_space<vmem>>, vector<1x128xf32>
      %48 = vector.broadcast %47 : vector<1x128xf32> to vector<8x128xf32>
      %49 = arith.addf %46, %48 : vector<8x128xf32>
      %c0_25 = arith.constant 0 : index
      %c0_26 = arith.constant 0 : index
      %50 = vector.load %arg16[%c0_25, %c0_26] : memref<8x128xf32, #tpu.memory_space<vmem>>, vector<8x128xf32>
      tpu.vector_store %arg16[%c0_25, %c0_26], %49 {strides = array<i32>} : memref<8x128xf32, #tpu.memory_space<vmem>>, vector<8x128xf32>,
      %51 = arith.truncf %49 : vector<8x128xf32> to vector<8x128xbf16>
      %c0_27 = arith.constant 0 : index
      %c0_28 = arith.constant 0 : index
      %52 = vector.load %arg9[%c0_27, %c0_28] : memref<128x128xbf16, #tpu.memory_space<vmem>>, vector<128x128xbf16>
      %cst_29 = arith.constant dense<0.000000e+00> : vector<8x128xf32>
      %53 = tpu.matmul %51, %52, %cst_29 {dimension_numbers = #tpu.dot_dimension_numbers<[1], [0], [0], [1], [0, 0, 1, 1], [], []>} : vector<8x128xbf16>, vector<128x128xbf16>, vector<8x128xf32> -> vector<8x128xf32>
      %c0_30 = arith.constant 0 : index
      %c0_31 = arith.constant 0 : index
      %54 = vector.load %arg10[%c0_30, %c0_31] : memref<1x128xf32, #tpu.memory_space<vmem>>, vector<1x128xf32>
      %55 = vector.broadcast %54 : vector<1x128xf32> to vector<8x128xf32>
      %56 = arith.addf %53, %55 : vector<8x128xf32>
      %c0_32 = arith.constant 0 : index
      %c0_33 = arith.constant 0 : index
      %57 = vector.load %arg11[%c0_32, %c0_33] : memref<1x128xf32, #tpu.memory_space<vmem>>, vector<1x128xf32>
      %c0_34 = arith.constant 0 : index
      %c0_35 = arith.constant 0 : index
      %58 = vector.load %arg12[%c0_34, %c0_35] : memref<1x128xf32, #tpu.memory_space<vmem>>, vector<1x128xf32>
      %cst_36 = arith.constant dense<0.000000e+00> : vector<128xf32>
      %59 = vector.multi_reduction <add>, %56, %cst_36 [0] : vector<8x128xf32> to vector<128xf32>
      %60 = vector.shape_cast %59 : vector<128xf32> to vector<1x128xf32>
      %cst_37 = arith.constant 8.000000e+00 : f32
      %61 = vector.broadcast %cst_37 : f32 to vector<1x128xf32>
      %62 = arith.divf %60, %61 : vector<1x128xf32>
      %63 = vector.broadcast %62 : vector<1x128xf32> to vector<8x128xf32>
      %64 = arith.subf %56, %63 : vector<8x128xf32>
      %65 = arith.mulf %64, %64 : vector<8x128xf32>
      %cst_38 = arith.constant dense<0.000000e+00> : vector<128xf32>
      %66 = vector.multi_reduction <add>, %65, %cst_38 [0] : vector<8x128xf32> to vector<128xf32>
      %67 = vector.shape_cast %66 : vector<128xf32> to vector<1x128xf32>
      %cst_39 = arith.constant 8.000000e+00 : f32
      %68 = vector.broadcast %cst_39 : f32 to vector<1x128xf32>
      %69 = arith.divf %67, %68 : vector<1x128xf32>
      %cst_40 = arith.constant 9.99999974E-6 : f32
      %70 = vector.broadcast %cst_40 : f32 to vector<1x128xf32>
      %71 = arith.addf %69, %70 : vector<1x128xf32>
      %72 = math.rsqrt %71 : vector<1x128xf32>
      %73 = vector.broadcast %72 : vector<1x128xf32> to vector<8x128xf32>
      %74 = arith.mulf %64, %73 : vector<8x128xf32>
      %75 = vector.broadcast %57 : vector<1x128xf32> to vector<8x128xf32>
      %76 = arith.mulf %74, %75 : vector<8x128xf32>
      %77 = vector.broadcast %58 : vector<1x128xf32> to vector<8x128xf32>
      %78 = arith.addf %76, %77 : vector<8x128xf32>
      %cst_41 = arith.constant 0.000000e+00 : f32
      %79 = vector.broadcast %cst_41 : f32 to vector<8x128xf32>
      %80 = arith.maximumf %78, %79 : vector<8x128xf32>
      %81 = arith.truncf %80 : vector<8x128xf32> to vector<8x128xbf16>
      %c0_42 = arith.constant 0 : index
      %c0_43 = arith.constant 0 : index
      %82 = vector.load %arg18[%c0_42, %c0_43] : memref<8x128xbf16, #tpu.memory_space<vmem>>, vector<8x128xbf16>
      tpu.vector_store %arg18[%c0_42, %c0_43], %81 {strides = array<i32>} : memref<8x128xbf16, #tpu.memory_space<vmem>>, vector<8x128xbf16>,
    } else {
    }
    %c1_i32 = arith.constant 1 : i32
    %13 = arith.cmpi eq, %arg0, %c1_i32 : i32
    %14 = arith.extui %13 : i1 to i32
    %c0_i32_7 = arith.constant 0 : i32
    %15 = arith.cmpi ne, %14, %c0_i32_7 : i32
    scf.if %15 {
      %c0 = arith.constant 0 : index
      %c0_8 = arith.constant 0 : index
      %16 = vector.load %arg18[%c0, %c0_8] : memref<8x128xbf16, #tpu.memory_space<vmem>>, vector<8x128xbf16>
      %c0_9 = arith.constant 0 : index
      %c0_10 = arith.constant 0 : index
      %17 = vector.load %arg13[%c0_9, %c0_10] : memref<128x128xbf16, #tpu.memory_space<vmem>>, vector<128x128xbf16>
      %cst = arith.constant dense<0.000000e+00> : vector<8x128xf32>
      %18 = tpu.matmul %16, %17, %cst {dimension_numbers = #tpu.dot_dimension_numbers<[1], [0], [0], [1], [0, 0, 1, 1], [], []>} : vector<8x128xbf16>, vector<128x128xbf16>, vector<8x128xf32> -> vector<8x128xf32>
      %c0_11 = arith.constant 0 : index
      %c0_12 = arith.constant 0 : index
      %19 = vector.load %arg14[%c0_11, %c0_12] : memref<1x128xf32, #tpu.memory_space<vmem>>, vector<1x128xf32>
      %20 = vector.broadcast %19 : vector<1x128xf32> to vector<8x128xf32>
      %21 = arith.addf %18, %20 : vector<8x128xf32>
      %cst_13 = arith.constant 5.000000e-01 : f32
      %22 = vector.broadcast %cst_13 : f32 to vector<8x128xf32>
      %23 = arith.mulf %22, %21 : vector<8x128xf32>
      %24 = math.tanh %23 : vector<8x128xf32>
      %cst_14 = arith.constant 1.000000e+00 : f32
      %25 = vector.broadcast %cst_14 : f32 to vector<8x128xf32>
      %26 = arith.addf %24, %25 : vector<8x128xf32>
      %cst_15 = arith.constant 5.000000e-01 : f32
      %27 = vector.broadcast %cst_15 : f32 to vector<8x128xf32>
      %28 = arith.mulf %27, %26 : vector<8x128xf32>
      %c0_16 = arith.constant 0 : index
      %c0_17 = arith.constant 0 : index
      %29 = vector.load %arg15[%c0_16, %c0_17] : memref<8x128xf32, #tpu.memory_space<vmem>>, vector<8x128xf32>
      tpu.vector_store %arg15[%c0_16, %c0_17], %28 {strides = array<i32>} : memref<8x128xf32, #tpu.memory_space<vmem>>, vector<8x128xf32>,
    } else {
    }
    return
  }
  func.func @transform_0(%arg0: i32, %arg1: i32) -> (i32, i32) {
    %c1_i32 = arith.constant 1 : i32
    %0 = arith.subi %c1_i32, %arg0 : i32
    %1 = arith.muli %arg1, %0 : i32
    %c0_i32 = arith.constant 0 : i32
    %2 = arith.muli %c0_i32, %arg0 : i32
    %3 = arith.addi %1, %2 : i32
    %c0_i32_0 = arith.constant 0 : i32
    %c0_i32_1 = arith.constant 0 : i32
    return %c0_i32_0, %3 : i32, i32
  }
  func.func @transform_1(%arg0: i32, %arg1: i32) -> (i32, i32) {
    %c1_i32 = arith.constant 1 : i32
    %0 = arith.subi %c1_i32, %arg0 : i32
    %1 = arith.muli %arg1, %0 : i32
    %c0_i32 = arith.constant 0 : i32
    %2 = arith.muli %c0_i32, %arg0 : i32
    %3 = arith.addi %1, %2 : i32
    %c0_i32_0 = arith.constant 0 : i32
    %c0_i32_1 = arith.constant 0 : i32
    return %3, %c0_i32_0 : i32, i32
  }
  func.func @transform_2(%arg0: i32, %arg1: i32) -> (i32, i32) {
    %c0_i32 = arith.constant 0 : i32
    %c0_i32_0 = arith.constant 0 : i32
    %c0_i32_1 = arith.constant 0 : i32
    return %c0_i32, %c0_i32_0 : i32, i32
  }
  func.func @transform_3(%arg0: i32, %arg1: i32) -> (i32, i32) {
    %c0_i32 = arith.constant 0 : i32
    %c0_i32_0 = arith.constant 0 : i32
    %c0_i32_1 = arith.constant 0 : i32
    return %c0_i32, %c0_i32_0 : i32, i32
  }
  func.func @transform_4(%arg0: i32, %arg1: i32) -> (i32, i32) {
    %c0_i32 = arith.constant 0 : i32
    %c0_i32_0 = arith.constant 0 : i32
    %c0_i32_1 = arith.constant 0 : i32
    return %c0_i32, %c0_i32_0 : i32, i32
  }
  func.func @transform_5(%arg0: i32, %arg1: i32) -> (i32, i32) {
    %c0_i32 = arith.constant 0 : i32
    %c0_i32_0 = arith.constant 0 : i32
    %c0_i32_1 = arith.constant 0 : i32
    return %c0_i32, %c0_i32_0 : i32, i32
  }
  func.func @transform_6(%arg0: i32, %arg1: i32) -> (i32, i32) {
    %c0_i32 = arith.constant 0 : i32
    %c0_i32_0 = arith.constant 0 : i32
    %c0_i32_1 = arith.constant 0 : i32
    return %c0_i32, %c0_i32_0 : i32, i32
  }
  func.func @transform_7(%arg0: i32, %arg1: i32) -> (i32, i32) {
    %c0_i32 = arith.constant 0 : i32
    %c0_i32_0 = arith.constant 0 : i32
    %c0_i32_1 = arith.constant 0 : i32
    return %c0_i32, %c0_i32_0 : i32, i32
  }
  func.func @transform_8(%arg0: i32, %arg1: i32) -> (i32, i32) {
    %c0_i32 = arith.constant 0 : i32
    %c0_i32_0 = arith.constant 0 : i32
    %c0_i32_1 = arith.constant 0 : i32
    return %c0_i32, %c0_i32_0 : i32, i32
  }
  func.func @transform_9(%arg0: i32, %arg1: i32) -> (i32, i32) {
    %c0_i32 = arith.constant 0 : i32
    %c0_i32_0 = arith.constant 0 : i32
    %c0_i32_1 = arith.constant 0 : i32
    return %c0_i32, %c0_i32_0 : i32, i32
  }
  func.func @transform_10(%arg0: i32, %arg1: i32) -> (i32, i32) {
    %c0_i32 = arith.constant 0 : i32
    %c0_i32_0 = arith.constant 0 : i32
    %c0_i32_1 = arith.constant 0 : i32
    return %c0_i32, %c0_i32_0 : i32, i32
  }
  func.func @transform_11(%arg0: i32, %arg1: i32) -> (i32, i32) {
    %0 = arith.muli %arg1, %arg0 : i32
    %c0_i32 = arith.constant 0 : i32
    %c0_i32_0 = arith.constant 0 : i32
    return %c0_i32, %0 : i32, i32
  }
  func.func @transform_12(%arg0: i32, %arg1: i32) -> (i32, i32) {
    %0 = arith.muli %arg1, %arg0 : i32
    %c0_i32 = arith.constant 0 : i32
    %c0_i32_0 = arith.constant 0 : i32
    return %c0_i32, %0 : i32, i32
  }
  func.func @transform_13(%arg0: i32, %arg1: i32) -> (i32, i32) {
    %0 = arith.muli %arg1, %arg0 : i32
    %c0_i32 = arith.constant 0 : i32
    %c0_i32_0 = arith.constant 0 : i32
    return %c0_i32, %0 : i32, i32
  }
  func.func @transform_14(%arg0: i32, %arg1: i32) -> (i32, i32) {
    %c0_i32 = arith.constant 0 : i32
    %c0_i32_0 = arith.constant 0 : i32
    %c0_i32_1 = arith.constant 0 : i32
    return %c0_i32, %c0_i32_0 : i32, i32
  }
}

</mosaic_0001>

<bundles_post_ra>
// kernel: autoencoder_forward.1
= control target key start
LH: loop header
LB: loop body
LE: loop exit
PB: predicated region body
PF: predicated region fallthrough
CT: control target
= control target key end

     0   :  { %20 = vsyncpa [#allocation5], 0  ;;  %s1893_s0 = inlined_call_operand.vmem [shape: bf16[8,128], index: 0, kind: input, shape index: {}]   ;;  %s1894_s1 = inlined_call_operand.vmem [shape: bf16[128,128], index: 1, kind: input, shape index: {}]   ;;  %s1895_s2 = inlined_call_operand.vmem [shape: f32[1,128], index: 2, kind: input, shape index: {}]   ;;  %s1896_s3 = inlined_call_operand.vmem [shape: f32[1,128], index: 3, kind: input, shape index: {}]   ;;  %s1897_s4 = inlined_call_operand.vmem [shape: f32[1,128], index: 4, kind: input, shape index: {}]   ;;  %s1898_s5 = inlined_call_operand.vmem [shape: bf16[128,128], index: 5, kind: input, shape index: {}]   ;;  %s1899_s6 = inlined_call_operand.vmem [shape: f32[1,128], index: 6, kind: input, shape index: {}]   ;;  %s1900_s7 = inlined_call_operand.vmem [shape: bf16[128,128], index: 7, kind: input, shape index: {}]   ;;  %s1901_s8 = inlined_call_operand.vmem [shape: f32[1,128], index: 8, kind: input, shape index: {}]   ;;  %s1902_s9 = inlined_call_operand.vmem [shape: f32[1,128], index: 9, kind: input, shape index: {}]   ;;  %s1903_s10 = inlined_call_operand.vmem [shape: f32[1,128], index: 10, kind: input, shape index: {}]   ;;  %s1904_s11 = inlined_call_operand.vmem [shape: bf16[128,128], index: 11, kind: input, shape index: {}]   ;;  %s1905_s12 = inlined_call_operand.vmem [shape: f32[1,128], index: 12, kind: input, shape index: {}]   ;;  %s1906_s13 = inlined_call_operand.hbm [shape: f32[8,128], index: 13, kind: output, shape index: {0}]   ;;  %s1907_s14 = inlined_call_operand.hbm [shape: f32[8,128], index: 14, kind: output, shape index: {1}]  }
   0x1   :  { %22 = vsyncpa [#allocation5 + $0x1], 0 }
   0x2   :  { %23 = vsyncpa [#allocation7], 0  ;;  %s1687_s29 = smov 0   ;;  %s1689_s30 = smov 0  }
   0x3   :  { %s1691_s15 = smov 0  }
   0x4 LB: > { %s1260_s16 = sadd.s32 4294967295, %s1601_s15   ;;  %s1261_s17 = sadd.s32 4294967294, %s1601_s15   ;;  %s1601_s15 = sphi %s1691_s15, %s29_s15   ;;  %s1597_s30 = sphi %s1689_s30, %s1910_s30   ;;  %s1593_s29 = sphi %s1687_s29, %s1909_s29  }
   0x5   : > { %s41_s18 = sadd.s32 1, %s1597_s30  ;;  %p1268_p0 = scmp.ge.s32.totalorder %s1601_s15, 1 }
   0x6   : > { %p43_p1 = scmp.ge.s32.totalorder %s41_s18, 2  ;;  %p479_p2 = scmp.lt.s32.totalorder %s1601_s15, 3 }
   0x8   : > { %s1912_s18 = smov (%p43_p1, %s41_s18), 0  ;;  %p480_p3 = pnand %p1268_p0, %p479_p2 }
   0x9   : > { %p573_p4 = scmp.eq.s32.totalorder (!%p480_p3), %s1593_s29, 0 }
   0xa   : > { %483 = sbr.rel (%p480_p3) target bundleno = 1056 (0x420), region = 72 }
   0xf   : > { %578 = sbr.rel (!%p573_p4) target bundleno = 20 (0x14), region = 76  ;;  %v1603_v0 = vmov (%p573_p4), 0.0  }
  0x10   : > { %579 = vst [vmem:[#allocation2] sm:$0xff] (%p573_p4), %v1603_v0 }
  0x14 PF: > { %p1270_p5 = scmp.ne.s32.totalorder %s1593_s29, 0 }
  0x16   : > { %582 = sbr.rel (%p1270_p5) target bundleno = 259 (0x103), region = 80 }
  0x1b   : > { %v1485_v1 = vld [vmem:[%s1894_s1 + $0x38] sm:$0xff]   ;;  %v1604_v2 = vmov 0.0   ;;  %v1486_v3 = vld [vmem:[%s1894_s1 + $0x30] sm:$0xff]   ;;  %vm1605_vm0 = vmmov 0   ;;  %v1487_v4 = vld [vmem:[%s1894_s1 + $0x28] sm:$0xff]  }
  0x1c   : > { %1355 = vmatprep.subr.bf16.mxu0 %v1604_v2  ;;  %1371 = vmatprep.mubr.msk.bf16.mxu0 %vm1605_vm0, %v1604_v2  ;;  %v1488_v5 = vld [vmem:[%s1894_s1 + $0x20] sm:$0xff]   ;;  %v1489_v6 = vld [vmem:[%s1894_s1 + $0x18] sm:$0xff]   ;;  %v1490_v7 = vld [vmem:[%s1894_s1 + $0x10] sm:$0xff]  }
  0x1d   : > { %1356 = vmatpush3.bf16.msra.mxu0 %v1485_v1  ;;  %v1491_v8 = vld [vmem:[%s1894_s1 + $0x8] sm:$0xff]   ;;  %v1492_v9 = vld [vmem:[%s1894_s1] sm:$0xff]  }
  0x1e   : > { %1357 = vmatprep.subr.bf16.mxu0 %v1604_v2  ;;  %v584_v10 = vld [vmem:[%s1893_s0] sm:$0xf] }
  0x1f   : > { %v583_v11 = vld [vmem:[#allocation2] sm:$0xff] }
  0x21   : > { %1358 = vmatpush3.bf16.msra.mxu0 %v1486_v3 }
  0x22   : > { %1359 = vmatprep.subr.bf16.mxu0 %v1604_v2 }
  0x25   : > { %1360 = vmatpush3.bf16.msra.mxu0 %v1487_v4 }
  0x26   : > { %1361 = vmatprep.subr.bf16.mxu0 %v1604_v2 }
  0x29   : > { %1362 = vmatpush3.bf16.msra.mxu0 %v1488_v5 }
  0x2a   : > { %1363 = vmatprep.subr.bf16.mxu0 %v1604_v2 }
  0x2d   : > { %1364 = vmatpush3.bf16.msra.mxu0 %v1489_v6 }
  0x2e   : > { %1365 = vmatprep.subr.bf16.mxu0 %v1604_v2 }
  0x31   : > { %1366 = vmatpush3.bf16.msra.mxu0 %v1490_v7 }
  0x32   : > { %1367 = vmatprep.subr.bf16.mxu0 %v1604_v2 }
  0x35   : > { %1368 = vmatpush3.bf16.msra.mxu0 %v1491_v8 }
  0x36   : > { %1369 = vmatprep.subr.bf16.mxu0 %v1604_v2 }
  0x39   : > { %1370 = vmatpush3.bf16.msra.mxu0 %v1492_v9 }
  0x3c   : > { %1372 = vmatmul.mubr.bf16.vlgmr.msra.gmra.mxu0 %v584_v10 }
  0xfc   : > { %v683_v12 = vpop.f32.mrf.mxu0 }
  0xfd   : > { %v689_v13 = vadd.f32 %v683_v12, %v583_v11 }
  0xfe   : > { %v1373_v14 = vpop.f32.mrf.mxu0 }
  0xff   : > { %690 = vst [vmem:[#allocation2] sm:$0xff] %v689_v13 }
 0x100   : > { %v686_v15 = vpop.f32.mrf.mxu0 }
 0x102   : > { %v1374_v16 = vpop.f32.mrf.mxu0 }
 0x103 PF: > { %692 = sbr.rel (!%p573_p4) target bundleno = 774 (0x306), region = 84  ;;  %v1493_v17 = vld [vmem:[%s1898_s5 + $0x38] sm:$0xff] (%p573_p4)   ;;  %v1606_v18 = vmov (%p573_p4), 0.0   ;;  %v1494_v19 = vld [vmem:[%s1898_s5 + $0x30] sm:$0xff] (%p573_p4)   ;;  %vm1607_vm1 = vmmov (%p573_p4), 0   ;;  %v1495_v20 = vld [vmem:[%s1898_s5 + $0x28] sm:$0xff] (%p573_p4)  }
 0x104   : > { %1375 = vmatprep.subr.bf16.mxu0 (%p573_p4), %v1606_v18  ;;  %1395 = vmatprep.subr.bf16.mxu1 (%p573_p4), %v1606_v18  ;;  %v1279_v22 = vld [vmem:[%s1895_s2] ss:$0 sm:$0xff] (%p573_p4)  ;;  %v1501_v25 = vld [vmem:[%s1900_s7 + $0x38] sm:$0xff] (%p573_p4)   ;;  %v1502_v27 = vld [vmem:[%s1900_s7 + $0x30] sm:$0xff] (%p573_p4)  }
 0x105   : > { %1376 = vmatpush3.bf16.msra.mxu0 (%p573_p4), %v1493_v17  ;;  %1391 = vmatprep.mubr.msk.bf16.mxu0 (%p573_p4), %vm1607_vm1, %v1606_v18  ;;  %v1496_v23 = vld [vmem:[%s1898_s5 + $0x20] sm:$0xff] (%p573_p4)   ;;  %v1497_v29 = vld [vmem:[%s1898_s5 + $0x18] sm:$0xff] (%p573_p4)   ;;  %v1503_v31 = vld [vmem:[%s1900_s7 + $0x28] sm:$0xff] (%p573_p4)  }
 0x106   : > { %1377 = vmatprep.subr.bf16.mxu0 (%p573_p4), %v1606_v18  ;;  %1411 = vmatprep.mubr.msk.bf16.mxu1 (%p573_p4), %vm1607_vm1, %v1606_v18  ;;  %v693_v21 = vld [vmem:[#allocation2] sm:$0xff] (%p573_p4)  ;;  %v1498_v33 = vld [vmem:[%s1898_s5 + $0x10] sm:$0xff] (%p573_p4)   ;;  %v1499_v37 = vld [vmem:[%s1898_s5 + $0x8] sm:$0xff] (%p573_p4)  }
 0x107   : > { %v701_v24 = vadd.f32 (%p573_p4), %v1279_v22, %v693_v21  ;;  %1396 = vmatpush3.bf16.msra.mxu1 (%p573_p4), %v1501_v25  ;;  %v1504_v35 = vld [vmem:[%s1900_s7 + $0x20] sm:$0xff] (%p573_p4)   ;;  %v1505_v39 = vld [vmem:[%s1900_s7 + $0x18] sm:$0xff] (%p573_p4)   ;;  %v1506_v43 = vld [vmem:[%s1900_s7 + $0x10] sm:$0xff] (%p573_p4)  }
 0x108   : > { %1397 = vmatprep.subr.bf16.mxu1 %v1606_v18  ;;  %v1500_v41 = vld [vmem:[%s1898_s5] sm:$0xff]   ;;  %v1507_v46 = vld [vmem:[%s1900_s7 + $0x8] sm:$0xff]  }
 0x109   : > { %1378 = vmatpush3.bf16.msra.mxu0 %v1494_v19  ;;  %v704_v26 = vrot.slane %v701_v24, 4  ;;  %v1280_v54 = vld [vmem:[%s1896_s3] ss:$0 sm:$0xff] }
 0x10a   : > { %1379 = vmatprep.subr.bf16.mxu0 %v1606_v18  ;;  %v1281_v56 = vld [vmem:[%s1897_s4] ss:$0 sm:$0xff] }
 0x10b   : > { %v705_v28 = vadd.f32 %v704_v26, %v701_v24  ;;  %1398 = vmatpush3.bf16.msra.mxu1 %v1502_v27  ;;  %v1508_v61 = vld [vmem:[%s1900_s7] sm:$0xff]  }
 0x10c   : > { %1399 = vmatprep.subr.bf16.mxu1 %v1606_v18  ;;  %v1282_v62 = vld [vmem:[%s1899_s6] ss:$0 sm:$0xff] }
 0x10d   : > { %1380 = vmatpush3.bf16.msra.mxu0 %v1495_v20  ;;  %v706_v30 = vrot.slane %v705_v28, 2  ;;  %v1291_v5 = vld [vmem:[%s1901_s8] ss:$0 sm:$0xff] }
 0x10e   : > { %1381 = vmatprep.subr.bf16.mxu0 %v1606_v18 }
 0x10f   : > { %v707_v32 = vadd.f32 %v706_v30, %v705_v28  ;;  %1400 = vmatpush3.bf16.msra.mxu1 %v1503_v31  ;;  %v1301_v31 = vld [vmem:[%s1903_s10] ss:$0 sm:$0xff] }
 0x110   : > { %1401 = vmatprep.subr.bf16.mxu1 %v1606_v18 }
 0x111   : > { %1382 = vmatpush3.bf16.msra.mxu0 %v1496_v23  ;;  %v708_v34 = vrot.slane %v707_v32, 1 }
 0x112   : > { %1383 = vmatprep.subr.bf16.mxu0 %v1606_v18 }
 0x113   : > { %v709_v36 = vadd.f32 %v708_v34, %v707_v32  ;;  %1402 = vmatpush3.bf16.msra.mxu1 %v1504_v35 }
 0x114   : > { %1403 = vmatprep.subr.bf16.mxu1 %v1606_v18 }
 0x115   : > { %1384 = vmatpush3.bf16.msra.mxu0 %v1497_v29  ;;  %v711_v38 = vmul.f32 0.125, %v709_v36  ;;  %v1300_v29 = vld [vmem:[%s1902_s9] ss:$0 sm:$0xff] }
 0x116   : > { %1385 = vmatprep.subr.bf16.mxu0 %v1606_v18 }
 0x117   : > { %v712_v40 = vsub.f32 %v701_v24, %v711_v38  ;;  %1404 = vmatpush3.bf16.msra.mxu1 %v1505_v39 }
 0x118   : > { %1405 = vmatprep.subr.bf16.mxu1 %v1606_v18 }
 0x119   : > { %1386 = vmatpush3.bf16.msra.mxu0 %v1498_v33  ;;  %v713_v42 = vmul.f32 %v712_v40, %v712_v40 }
 0x11a   : > { %1387 = vmatprep.subr.bf16.mxu0 %v1606_v18 }
 0x11b   : > { %v714_v44 = vrot.slane %v713_v42, 4  ;;  %1406 = vmatpush3.bf16.msra.mxu1 %v1506_v43 }
 0x11c   : > { %1407 = vmatprep.subr.bf16.mxu1 %v1606_v18 }
 0x11d   : > { %1388 = vmatpush3.bf16.msra.mxu0 %v1499_v37  ;;  %v715_v45 = vadd.f32 %v714_v44, %v713_v42 }
 0x11e   : > { %1389 = vmatprep.subr.bf16.mxu0 %v1606_v18 }
 0x11f   : > { %v716_v47 = vrot.slane %v715_v45, 2  ;;  %1408 = vmatpush3.bf16.msra.mxu1 %v1507_v46 }
 0x120   : > { %1409 = vmatprep.subr.bf16.mxu1 %v1606_v18 }
 0x121   : > { %1390 = vmatpush3.bf16.msra.mxu0 %v1500_v41  ;;  %v717_v48 = vadd.f32 %v716_v47, %v715_v45 }
 0x123   : > { %v718_v49 = vrot.slane %v717_v48, 1  ;;  %1410 = vmatpush3.bf16.msra.mxu1 %v1508_v61 }
 0x125   : > { %v719_v50 = vadd.f32 %v718_v49, %v717_v48 }
 0x127   : > { %v720_v51 = vmul.f32 0.125, %v719_v50 }
 0x129   : > { %v721_v52 = vadd.f32 1e-05, %v720_v51 }
 0x12b   : > { %1509 = vrsqrt.f32 %v721_v52 }
 0x138   : > { %v1510_v53 = vpop.eup %1509 }
 0x139   : > { %v723_v55 = vmul.f32 %v1510_v53, %v712_v40 }
 0x13b   : > { %v730_v57 = vmul.f32 %v1280_v54, %v723_v55 }
 0x13d   : > { %v737_v58 = vadd.f32 %v1281_v56, %v730_v57 }
 0x13f   : > { %v738_v59 = vmax.f32 %v737_v58, 0.0 }
 0x141   : > { %v739_v60 = vpack.c.bf16 %v738_v59, %v738_v59 }
 0x143   : > { %1392 = vmatmul.mubr.bf16.vlgmr.msra.gmra.mxu0 %v739_v60 }
 0x203   : > { %v845_v63 = vpop.f32.mrf.mxu0 }
 0x204   : > { %v846_v0 = vadd.f32 %v1282_v62, %v845_v63 }
 0x205   : > { %v1393_v1 = vpop.f32.mrf.mxu0 }
 0x206   : > { %851 = vst [vmem:[#allocation6] sm:$0xff] %v846_v0  ;;  %v852_v2 = vpack.c.bf16 %v846_v0, %v846_v0 }
 0x207   : > { %v848_v3 = vpop.f32.mrf.mxu0 }
 0x208   : > { %1412 = vmatmul.mubr.bf16.vlgmr.msra.gmra.mxu1 %v852_v2 }
 0x209   : > { %v1394_v4 = vpop.f32.mrf.mxu0 }
 0x2c8   : > { %v958_v6 = vpop.f32.mrf.mxu1 }
 0x2c9   : > { %v959_v7 = vadd.f32 %v1291_v5, %v958_v6 }
 0x2ca   : > { %v1413_v8 = vpop.f32.mrf.mxu1 }
 0x2cb   : > { %v966_v9 = vrot.slane %v959_v7, 4 }
 0x2cc   : > { %v961_v10 = vpop.f32.mrf.mxu1 }
 0x2cd   : > { %v967_v11 = vadd.f32 %v966_v9, %v959_v7 }
 0x2ce   : > { %v1414_v12 = vpop.f32.mrf.mxu1 }
 0x2cf   : > { %v968_v13 = vrot.slane %v967_v11, 2 }
 0x2d1   : > { %v969_v14 = vadd.f32 %v968_v13, %v967_v11 }
 0x2d3   : > { %v970_v15 = vrot.slane %v969_v14, 1 }
 0x2d5   : > { %v971_v16 = vadd.f32 %v970_v15, %v969_v14 }
 0x2d7   : > { %v972_v17 = vmul.f32 0.125, %v971_v16 }
 0x2d9   : > { %v973_v18 = vsub.f32 %v959_v7, %v972_v17 }
 0x2db   : > { %v974_v19 = vmul.f32 %v973_v18, %v973_v18 }
 0x2dd   : > { %v975_v20 = vrot.slane %v974_v19, 4 }
 0x2df   : > { %v976_v21 = vadd.f32 %v975_v20, %v974_v19 }
 0x2e1   : > { %v977_v22 = vrot.slane %v976_v21, 2 }
 0x2e3   : > { %v978_v23 = vadd.f32 %v977_v22, %v976_v21 }
 0x2e5   : > { %v979_v24 = vrot.slane %v978_v23, 1 }
 0x2e7   : > { %v980_v25 = vadd.f32 %v979_v24, %v978_v23 }
 0x2e9   : > { %v981_v26 = vmul.f32 0.125, %v980_v25 }
 0x2eb   : > { %v982_v27 = vadd.f32 1e-05, %v981_v26 }
 0x2ed   : > { %1511 = vrsqrt.f32 %v982_v27 }
 0x2fa   : > { %v1512_v28 = vpop.eup %1511 }
 0x2fb   : > { %v984_v30 = vmul.f32 %v1512_v28, %v973_v18 }
 0x2fd   : > { %v991_v32 = vmul.f32 %v1300_v29, %v984_v30 }
 0x2ff   : > { %v998_v33 = vadd.f32 %v1301_v31, %v991_v32 }
 0x301   : > { %v999_v34 = vmax.f32 %v998_v33, 0.0 }
 0x303   : > { %v1000_v35 = vpack.c.bf16 %v999_v34, %v999_v34 }
 0x305   : > { %1001 = vst [vmem:[#allocation3] sm:$0xf] %v1000_v35 }
 0x306 PF: > { %p1302_p6 = scmp.ne.s32.totalorder %s1593_s29, 1 }
 0x308   : > { %1005 = sbr.rel (%p1302_p6) target bundleno = 1030 (0x406), region = 88 }
 0x30d   : > { %v1513_v36 = vld [vmem:[%s1904_s11 + $0x38] sm:$0xff]   ;;  %v1608_v37 = vmov 0.0   ;;  %v1514_v38 = vld [vmem:[%s1904_s11 + $0x30] sm:$0xff]   ;;  %vm1609_vm2 = vmmov 0   ;;  %v1515_v39 = vld [vmem:[%s1904_s11 + $0x28] sm:$0xff]  }
 0x30e   : > { %1415 = vmatprep.subr.bf16.mxu0 %v1608_v37  ;;  %1431 = vmatprep.mubr.msk.bf16.mxu0 %vm1609_vm2, %v1608_v37  ;;  %v1516_v40 = vld [vmem:[%s1904_s11 + $0x20] sm:$0xff]   ;;  %v1517_v41 = vld [vmem:[%s1904_s11 + $0x18] sm:$0xff]   ;;  %v1518_v42 = vld [vmem:[%s1904_s11 + $0x10] sm:$0xff]  }
 0x30f   : > { %1416 = vmatpush3.bf16.msra.mxu0 %v1513_v36  ;;  %v1519_v43 = vld [vmem:[%s1904_s11 + $0x8] sm:$0xff]   ;;  %v1520_v44 = vld [vmem:[%s1904_s11] sm:$0xff]  }
 0x310   : > { %1417 = vmatprep.subr.bf16.mxu0 %v1608_v37  ;;  %v1006_v45 = vld [vmem:[#allocation3] sm:$0xf]  ;;  %v1303_v46 = vld [vmem:[%s1905_s12] ss:$0 sm:$0xff] }
 0x313   : > { %1418 = vmatpush3.bf16.msra.mxu0 %v1514_v38 }
 0x314   : > { %1419 = vmatprep.subr.bf16.mxu0 %v1608_v37 }
 0x317   : > { %1420 = vmatpush3.bf16.msra.mxu0 %v1515_v39 }
 0x318   : > { %1421 = vmatprep.subr.bf16.mxu0 %v1608_v37 }
 0x31b   : > { %1422 = vmatpush3.bf16.msra.mxu0 %v1516_v40 }
 0x31c   : > { %1423 = vmatprep.subr.bf16.mxu0 %v1608_v37 }
 0x31f   : > { %1424 = vmatpush3.bf16.msra.mxu0 %v1517_v41 }
 0x320   : > { %1425 = vmatprep.subr.bf16.mxu0 %v1608_v37 }
 0x323   : > { %1426 = vmatpush3.bf16.msra.mxu0 %v1518_v42 }
 0x324   : > { %1427 = vmatprep.subr.bf16.mxu0 %v1608_v37 }
 0x327   : > { %1428 = vmatpush3.bf16.msra.mxu0 %v1519_v43 }
 0x328   : > { %1429 = vmatprep.subr.bf16.mxu0 %v1608_v37 }
 0x32b   : > { %1430 = vmatpush3.bf16.msra.mxu0 %v1520_v44 }
 0x32e   : > { %1432 = vmatmul.mubr.bf16.vlgmr.msra.gmra.mxu0 %v1006_v45 }
 0x3ee   : > { %v1112_v47 = vpop.f32.mrf.mxu0 }
 0x3ef   : > { %v1113_v48 = vadd.f32 %v1303_v46, %v1112_v47 }
 0x3f0   : > { %v1433_v49 = vpop.f32.mrf.mxu0 }
 0x3f1   : > { %v1118_v50 = vmul.f32 0.5, %v1113_v48 }
 0x3f2   : > { %v1115_v51 = vpop.f32.mrf.mxu0 }
 0x3f3   : > { %1521 = vtanh.f32 %v1118_v50 }
 0x3f4   : > { %v1434_v52 = vpop.f32.mrf.mxu0 }
 0x400   : > { %v1522_v53 = vpop.eup %1521 }
 0x401   : > { %v1120_v54 = vadd.f32 1.0, %v1522_v53 }
 0x403   : > { %v1121_v55 = vmul.f32 0.5, %v1120_v54 }
 0x405   : > { %1122 = vst [vmem:[#allocation4] sm:$0xff] %v1121_v55 }
 0x406 PF: > { %p1859_p7 = scmp.eq.s32.totalorder %s1260_s16, 1  ;;  %s1610_s20 = smov [#allocation4]  }
 0x407   : > { %s1138_s21 = sshll.u32 %s1610_s20, 4  ;;  %s1611_s22 = smov [#allocation6]   ;;  %s1139_s21 = int_to_ptr.vmem [resolvable:$true] %s1138_s21 }
 0x408   : > { %s1149_s23 = sshll.u32 %s1611_s22, 4  ;;  %s1523_s24 = scalar_lea.vmem %s1139_s21, 128  ;;  %s1150_s23 = int_to_ptr.vmem [resolvable:$true] %s1149_s23 }
 0x409   : > { %p1524_p8 = scmp.ne.s32.totalorder %s1139_s21, %s1523_s24  ;;  %s1529_s25 = scalar_lea.vmem %s1139_s21, 256 }
 0x40a   : > { %p1530_p11 = scmp.lt.s32.totalorder %s1139_s21, %s1139_s21  ;;  %p1531_p12 = scmp.lt.s32.totalorder %s1529_s25, %s1523_s24 }
 0x40b   : > { %p1525_p9 = pnand %p1524_p8, %p1859_p7 }
 0x40c   : > { %p1532_p13 = por %p1531_p12, %p1530_p11 }
 0x40d   : > { %p1526_p10 = pneg %p1525_p9 }
 0x40f   : > { %p1533_p0 = pnand %p1532_p13, %p1526_p10 }
 0x411   : > { %1536 = shalt.err (!%p1533_p0)
}
 0x412   : > { %1436 = dma.vmem_to_hbm [thread:$0]  (%p1859_p7), %s1139_s21, 128, %s1906_s13, [#allocation5]  }
 0x413   : > { %s1547_s27 = scalar_lea.vmem %s1150_s23, 128  ;;  %p1554_p4 = scmp.lt.s32.totalorder %s1150_s23, %s1150_s23 }
 0x414   : > { %p1548_p1 = scmp.ne.s32.totalorder %s1150_s23, %s1547_s27  ;;  %p1555_p5 = scmp.lt.s32.totalorder %s1547_s27, %s1547_s27 }
 0x416   : > { %p1549_p2 = pnand %p1548_p1, %p1859_p7  ;;  %p1556_p6 = por %p1555_p5, %p1554_p4 }
 0x418   : > { %p1550_p3 = pneg %p1549_p2 }
 0x41a   : > { %p1557_p8 = pnand %p1556_p6, %p1550_p3 }
 0x41c   : > { %1560 = shalt.err (!%p1557_p8)
}
 0x41d   : > { %1438 = dma.vmem_to_hbm [thread:$0]  (%p1859_p7), %s1150_s23, 128, %s1907_s14, [#allocation7]  }
 0x41e   : > { %1584 = dma.done.wait (%p1859_p7), [#allocation7], 128  }
 0x41f   : > { %1586 = vsyncadd (%p1859_p7), [#allocation7], 4294967168 }
 0x420 PF: > { %p1450_p9 = scmp.ge.s32.totalorder %s1601_s15, 2  ;;  %p1451_p10 = scmp.eq.s32.totalorder %s1261_s17, 1 }
 0x422   : > { %p1444_p11 = pnand %p1451_p10, %p1450_p9 }
 0x424   : > { %p1445_p12 = pneg %p1444_p11 }
 0x426   : > { %1588 = dma.done.wait (%p1445_p12), [#allocation5], 128  }
 0x427   : > { %1590 = vsyncadd (%p1445_p12), [#allocation5], 4294967168  ;;  %s29_s15 = sadd.s32 1, %s1601_s15   ;;  %s1909_s29 = smov %s1597_s30 }
 0x428   : > { %p26_p13 = scmp.ge.s32.totalorder %s29_s15, 4   ;;  %s1910_s30 = smov %s1912_s18 }
 0x42a   :  { %28 = sbr.rel (!%p26_p13) target bundleno = 4 (0x4), region = 140 }
 0x42f   :  { %1171 = vsyncpa [#allocation5], 1 }
 0x430   :  { %1173 = vsyncpa [#allocation5 + $0x1], 1 }
 0x431   :  { %1174 = vsyncpa [#allocation7], 1 }

</bundles_post_ra>
